<compile_context>
chip_gen: v7x
topology: tpu7x:2x2x1
jax: 0.10.0
libtpu: 0.0.40
codegen_flags: <defaults>
</compile_context>

<pallas_src>
import math

import jax
import jax.numpy as jnp
from jax.experimental import pallas as pl
from jax.experimental.pallas import tpu as pltpu

_SQRT_2_OVER_PI = math.sqrt(2.0 / math.pi)


def _gelu_tanh(x):
    # nn.GELU(approximate='tanh'):
    #   0.5 * x * (1 + tanh(sqrt(2/pi) * (x + 0.044715 * x^3)))
    return 0.5 * x * (1.0 + jnp.tanh(_SQRT_2_OVER_PI * (x + 0.044715 * x * x * x)))


def mlp_kernel(x_ref, wpre_ref, wo_ref, o_ref):
    # x_ref:    (tm, dim)        matmul dtype (bf16 or f32)
    # wpre_ref: (dim, hidden)    folded wi.wh1.wh2.wh3 (pre-transposed)
    # wo_ref:   (hidden, out_p)  lane-padded output projection (pre-transposed)
    # o_ref:    (tm, out_p)      lane-dense output tile (out_p multiple of 128)
    a = jnp.dot(x_ref[...], wpre_ref[...], preferred_element_type=jnp.float32)
    b = _gelu_tanh(a)                       # keep GELU in f32 (VPU/EUP)
    b = b.astype(wo_ref.dtype)              # back to matmul dtype for the MXU
    o_ref[...] = jnp.dot(
        b, wo_ref[...], preferred_element_type=jnp.float32
    ).astype(o_ref.dtype)


def mlp_forward(x, wi, wh1, wh2, wh3, wo, *, tm=128, use_bf16=True):
    """x: (B, dim); w*: PyTorch-convention (out_features, in_features)."""
    B, dim = x.shape
    hidden = wi.shape[0]
    out_dim = wo.shape[0]
    out_dtype = x.dtype

    # --- Fold the four bias-free linear layers (exact algebra, done in f32) --
    # x @ wi.T @ wh1.T @ wh2.T @ wh3.T  ==  x @ (wh3 @ wh2 @ wh1 @ wi).T
    w_pre = (wh3 @ wh2 @ wh1 @ wi).T.astype(jnp.float32)      # (dim, hidden)
    wo_t = wo.T.astype(jnp.float32)                           # (hidden, out_dim)

    # --- Lane-dense output: pad out_dim up to a multiple of 128 --------------
    out_p = ((out_dim + 127) // 128) * 128
    if out_p != out_dim:
        wo_t = jnp.pad(wo_t, ((0, 0), (0, out_p - out_dim)))

    # --- Batch tiling: large tiles, pad B instead of requiring divisibility --
    tm = max(8, min(tm, ((B + 7) // 8) * 8))
    b_pad = ((B + tm - 1) // tm) * tm
    x_p = jnp.pad(x, ((0, b_pad - B), (0, 0))) if b_pad != B else x
    grid = (b_pad // tm,)

    # --- bf16 matmul inputs (f32 accumulate); GELU stays in f32 --------------
    mm_dtype = jnp.bfloat16 if use_bf16 else x.dtype
    x_p = x_p.astype(mm_dtype)
    w_pre = w_pre.astype(mm_dtype)
    wo_t = wo_t.astype(mm_dtype)

    mm_bytes = jnp.dtype(mm_dtype).itemsize
    cost = pl.CostEstimate(
        flops=2 * b_pad * (dim * hidden + hidden * out_p),
        transcendentals=b_pad * hidden,                        # tanh in GELU
        bytes_accessed=(b_pad * dim + dim * hidden + hidden * out_p) * mm_bytes
        + b_pad * out_p * jnp.dtype(out_dtype).itemsize,
    )

    out_padded = pl.pallas_call(
        mlp_kernel,
        out_shape=jax.ShapeDtypeStruct((b_pad, out_p), out_dtype),
        grid_spec=pltpu.PrefetchScalarGridSpec(
            num_scalar_prefetch=0,
            grid=grid,
            in_specs=[
                pl.BlockSpec((tm, dim), lambda i: (i, 0)),
                # Constant index maps: weights stay resident in VMEM across
                # grid steps (no per-step re-DMA).  For non-toy hidden sizes
                # on v7x (64 MiB VMEM) the contraction dim should be tiled
                # instead of loading whole weights.
                pl.BlockSpec((dim, hidden), lambda i: (0, 0)),
                pl.BlockSpec((hidden, out_p), lambda i: (0, 0)),
            ],
            out_specs=pl.BlockSpec((tm, out_p), lambda i: (i, 0)),
        ),
        compiler_params=pltpu.CompilerParams(
            # Batch tiles are independent -> megacore sharding on v7x (2 TCs).
            dimension_semantics=("parallel",),
        ),
        cost_estimate=cost,
    )(x_p, w_pre, wo_t)

    return out_padded[:B, :out_dim]


def _kaiming_normal(key, out_features, in_features, dtype=jnp.float32):
    # nn.init.kaiming_normal_ default: fan_in mode, gain=sqrt(2) (relu)
    std = math.sqrt(2.0 / in_features)
    return std * jax.random.normal(key, (out_features, in_features), dtype=dtype)


def _reference(x, wi, wh1, wh2, wh3, wo):
    a = x @ wi.T
    a = a @ wh1.T
    a = a @ wh2.T
    a = a @ wh3.T
    b = _gelu_tanh(a)
    return b @ wo.T


if __name__ == "__main__":
    # Small shapes consistent with the module: dim=32, hidden_dim=64, out_dim=32.
    # B=256 with tm=128 -> 2 parallel grid steps (both TCs busy on v7x).
    B, dim, hidden, out_dim = 256, 32, 64, 32

    key = jax.random.PRNGKey(0)
    kx, k1, k2, k3, k4, k5 = jax.random.split(key, 6)

    x = jax.random.normal(kx, (B, dim), dtype=jnp.float32)
    wi = _kaiming_normal(k1, hidden, dim)
    wh1 = _kaiming_normal(k2, hidden, hidden)
    wh2 = _kaiming_normal(k3, hidden, hidden)  # original module leaves wh2 at
    # default init (kaiming called on wh3 twice — likely a typo); we init it
    # deterministically anyway, which does not change the kernel.
    wh3 = _kaiming_normal(k4, hidden, hidden)
    wo = _kaiming_normal(k5, out_dim, hidden)

    ref = _reference(x, wi, wh1, wh2, wh3, wo)

    # f32 path: tight check (folding only reorders f32 rounding).
    out_f32 = jax.block_until_ready(
        mlp_forward(x, wi, wh1, wh2, wh3, wo, tm=128, use_bf16=False)
    )
    assert out_f32.shape == (B, out_dim)
    assert jnp.allclose(out_f32, ref, atol=1e-3, rtol=1e-3), "f32 mismatch vs reference"

    # bf16 matmul-input path (v6e/v7x fast path): looser tolerance.
    out_bf16 = jax.block_until_ready(
        mlp_forward(x, wi, wh1, wh2, wh3, wo, tm=128, use_bf16=True)
    )
    assert out_bf16.shape == (B, out_dim)
    assert jnp.allclose(out_bf16, ref, atol=1e-1, rtol=5e-2), "bf16 mismatch vs reference"

    print("KERNEL_OK")
</pallas_src>

<mosaic_0001>
module attributes {stable_mosaic.version = 11 : i64} {
  func.func @mlp_kernel(%arg0: i32, %arg1: memref<128x32xf32, #tpu.memory_space<vmem>>, %arg2: memref<32x64xf32, #tpu.memory_space<vmem>>, %arg3: memref<64x128xf32, #tpu.memory_space<vmem>>, %arg4: memref<128x128xf32, #tpu.memory_space<vmem>>) attributes {dimension_semantics = [#tpu.dimension_semantics<parallel>], iteration_bounds = array<i64: 2>, scalar_prefetch = 0 : i64, scratch_operands = 0 : i64, tpu.core_type = #tpu.core_type<tc>, window_params = [{transform_indices = @transform_0, window_bounds = array<i64: 128, 32>}, {pipeline_mode = #tpu.pipeline_mode<synchronous>, transform_indices = @transform_1, window_bounds = array<i64: 32, 64>}, {pipeline_mode = #tpu.pipeline_mode<synchronous>, transform_indices = @transform_2, window_bounds = array<i64: 64, 128>}, {transform_indices = @transform_3, window_bounds = array<i64: 128, 128>}]} {
    %c0 = arith.constant 0 : index
    %c0_0 = arith.constant 0 : index
    %0 = vector.load %arg1[%c0, %c0_0] : memref<128x32xf32, #tpu.memory_space<vmem>>, vector<128x32xf32>
    %c0_1 = arith.constant 0 : index
    %c0_2 = arith.constant 0 : index
    %1 = vector.load %arg2[%c0_1, %c0_2] : memref<32x64xf32, #tpu.memory_space<vmem>>, vector<32x64xf32>
    %cst = arith.constant dense<0.000000e+00> : vector<128x64xf32>
    %2 = tpu.matmul %0, %1, %cst {dimension_numbers = #tpu.dot_dimension_numbers<[1], [0], [0], [1], [0, 0, 1, 1], [], []>} : vector<128x32xf32>, vector<32x64xf32>, vector<128x64xf32> -> vector<128x64xf32>
    %cst_3 = arith.constant 5.000000e-01 : f32
    %3 = vector.broadcast %cst_3 : f32 to vector<128x64xf32>
    %4 = arith.mulf %3, %2 : vector<128x64xf32>
    %cst_4 = arith.constant 4.471500e-02 : f32
    %5 = vector.broadcast %cst_4 : f32 to vector<128x64xf32>
    %6 = arith.mulf %5, %2 : vector<128x64xf32>
    %7 = arith.mulf %6, %2 : vector<128x64xf32>
    %8 = arith.mulf %7, %2 : vector<128x64xf32>
    %9 = arith.addf %2, %8 : vector<128x64xf32>
    %cst_5 = arith.constant 0.797884583 : f32
    %10 = vector.broadcast %cst_5 : f32 to vector<128x64xf32>
    %11 = arith.mulf %10, %9 : vector<128x64xf32>
    %12 = math.tanh %11 : vector<128x64xf32>
    %cst_6 = arith.constant 1.000000e+00 : f32
    %13 = vector.broadcast %cst_6 : f32 to vector<128x64xf32>
    %14 = arith.addf %13, %12 : vector<128x64xf32>
    %15 = arith.mulf %4, %14 : vector<128x64xf32>
    %c0_7 = arith.constant 0 : index
    %c0_8 = arith.constant 0 : index
    %16 = vector.load %arg3[%c0_7, %c0_8] : memref<64x128xf32, #tpu.memory_space<vmem>>, vector<64x128xf32>
    %cst_9 = arith.constant dense<0.000000e+00> : vector<128x128xf32>
    %17 = tpu.matmul %15, %16, %cst_9 {dimension_numbers = #tpu.dot_dimension_numbers<[1], [0], [0], [1], [0, 0, 1, 1], [], []>} : vector<128x64xf32>, vector<64x128xf32>, vector<128x128xf32> -> vector<128x128xf32>
    %c0_10 = arith.constant 0 : index
    %c0_11 = arith.constant 0 : index
    %18 = vector.load %arg4[%c0_10, %c0_11] : memref<128x128xf32, #tpu.memory_space<vmem>>, vector<128x128xf32>
    tpu.vector_store %arg4[%c0_10, %c0_11], %17 {strides = array<i32>} : memref<128x128xf32, #tpu.memory_space<vmem>>, vector<128x128xf32>,
    return
  }
  func.func @transform_0(%arg0: i32) -> (i32, i32) {
    %c0_i32 = arith.constant 0 : i32
    %c0_i32_0 = arith.constant 0 : i32
    return %arg0, %c0_i32 : i32, i32
  }
  func.func @transform_1(%arg0: i32) -> (i32, i32) {
    %c0_i32 = arith.constant 0 : i32
    %c0_i32_0 = arith.constant 0 : i32
    %c0_i32_1 = arith.constant 0 : i32
    return %c0_i32, %c0_i32_0 : i32, i32
  }
  func.func @transform_2(%arg0: i32) -> (i32, i32) {
    %c0_i32 = arith.constant 0 : i32
    %c0_i32_0 = arith.constant 0 : i32
    %c0_i32_1 = arith.constant 0 : i32
    return %c0_i32, %c0_i32_0 : i32, i32
  }
  func.func @transform_3(%arg0: i32) -> (i32, i32) {
    %c0_i32 = arith.constant 0 : i32
    %c0_i32_0 = arith.constant 0 : i32
    return %arg0, %c0_i32 : i32, i32
  }
}

</mosaic_0001>

<bundles_post_ra>
// kernel: tpu_custom_call.1
= control target key start
LH: loop header
LB: loop body
LE: loop exit
PB: predicated region body
PF: predicated region fallthrough
CT: control target
= control target key end

     0   :  { %8 = vsyncpa [#allocation3], 0  ;;  %s1493_s0 = inlined_call_operand.vmem [shape: f32[256,32], index: 0, kind: input, shape index: {}]   ;;  %s1494_s1 = inlined_call_operand.vmem [shape: f32[32,64], index: 1, kind: input, shape index: {}]   ;;  %s1495_s2 = inlined_call_operand.vmem [shape: f32[64,128], index: 2, kind: input, shape index: {}]   ;;  %s1496_s3 = inlined_call_operand.hbm [shape: f32[256,128], index: 3, kind: output, shape index: {}]  }
   0x1   :  { %10 = vsyncpa [#allocation3 + $0x1], 0  ;;  %s1177_s12 = smov 0   ;;  %s1179_s13 = smov 0  }
   0x2   :  { %s1181_s14 = smov 0   ;;  %s1183_s15 = smov 0  }
   0x3 LB: > { %s1198_s16 = sadd.s32 4294967295, %s1152_s15   ;;  %s824_s17 = sadd.s32 4294967294, %s1152_s15   ;;  %s1152_s15 = sphi %s1183_s15, %s1502_s15   ;;  %s1148_s14 = sphi %s1181_s14, %s1501_s14   ;;  %s1144_s13 = sphi %s1179_s13, %s1500_s13   ;;  %s1140_s12 = sphi %s1177_s12, %s1499_s12  }
   0x4   : > { %s1202_s18 = sadd.s32 1, %s1152_s15   ;;  %s91_s19 = sadd.s32 1, %s1148_s14 }
   0x5   : > { %s88_s20 = ssub.s32 %s1152_s15, %s1202_s18  ;;  %p101_p0 = scmp.ne.s32.totalorder %s1148_s14, %s1144_s13 }
   0x6   : > { %p89_p1 = scmp.eq.s32.totalorder %s88_s20, 0  ;;  %p102_p2 = scmp.eq.s32.totalorder %s1198_s16, 1 }
   0x7   : > { %p107_p3 = scmp.ne.s32.totalorder %s1144_s13, %s1140_s12  ;;  %p108_p4 = scmp.eq.s32.totalorder %s824_s17, 1 }
   0x8   : > { %s1213_s21 = scalar_select %p89_p1, %s1148_s14, %s91_s19  }
   0x9   : > { %p1215_p5 = por %p102_p2, %p101_p0  ;;  %p1219_p6 = por %p108_p4, %p107_p3 }
   0xa   : > { %p827_p7 = scmp.ge.s32.totalorder %s1152_s15, 1  ;;  %p141_p8 = scmp.lt.s32.totalorder %s1152_s15, 3 }
   0xc   : > { %p142_p9 = pnand %p827_p7, %p141_p8 }
   0xd   : > { %v188_v0 = vld [vmem:[%s1494_s1] sm:$0xff] (!%p142_p9)  ;;  %v189_v1 = vld [vmem:[%s1494_s1 + $0x8] sm:$0xff] (!%p142_p9)  ;;  %v190_v2 = vld [vmem:[%s1494_s1 + $0x10] sm:$0xff] (!%p142_p9)  ;;  %s829_s30 = sshll.u32 (!%p142_p9), %s1198_s16, 4  ;;  %vm192_vm0 = vcmask (!%p142_p9), 261120   ;;  %vm538_vm1 = vcmask (!%p142_p9), 523264  }
   0xe   : > { %145 = sbr.rel (%p142_p9) target bundleno = 521 (0x209), region = 32  ;;  %v985_v3 = vpack.c.bf16 (!%p142_p9), %v189_v1, %v188_v0  ;;  %v191_v4 = vld [vmem:[%s1494_s1 + $0x18] sm:$0xff] (!%p142_p9)  ;;  %p166_p10 = scmp.lt.s32.totalorder (!%p142_p9), %s829_s30, 31  ;;  %v530_v22 = vld [vmem:[%s1495_s2] sm:$0xff] (!%p142_p9)  ;;  %v531_v23 = vld [vmem:[%s1495_s2 + $0x8] sm:$0xff] (!%p142_p9) }
   0xf   : > { %v989_v5 = vpack.c.bf16 (!%p142_p9), %v191_v4, %v190_v2  ;;  %v993_v24 = vpack.c.bf16 (!%p142_p9), %v531_v23, %v530_v22  ;;  %v532_v25 = vld [vmem:[%s1495_s2 + $0x10] sm:$0xff] (!%p142_p9)  ;;  %v533_v26 = vld [vmem:[%s1495_s2 + $0x18] sm:$0xff] (!%p142_p9)  ;;  %v534_v28 = vld [vmem:[%s1495_s2 + $0x20] sm:$0xff] (!%p142_p9)  ;;  %s162_s8 = sand.u32 (!%p142_p9), 1, %s1144_s13   ;;  %s868_s11 = sshll.u32 (!%p142_p9), %s1198_s16, 11 }
  0x10   : > { %986 = vmatprep.subr.bf16.mxu0 (!%p142_p9), %v985_v3  ;;  %v997_v27 = vpack.c.bf16 (!%p142_p9), %v533_v26, %v532_v25  ;;  %v535_v29 = vld [vmem:[%s1495_s2 + $0x28] sm:$0xff] (!%p142_p9)  ;;  %v536_v31 = vld [vmem:[%s1495_s2 + $0x30] sm:$0xff] (!%p142_p9)  ;;  %v537_v32 = vld [vmem:[%s1495_s2 + $0x38] sm:$0xff] (!%p142_p9)  ;;  %s1444_s24 = scalar_lea.hbm (!%p142_p9), %s1496_s3, %s868_s11  ;;  %s1452_s16 = scalar_lea.sflag (!%p142_p9), [#allocation3], %s162_s8 }
  0x11   : > { %988 = vmatpush3.bf16.msra.mxu0 (!%p142_p9), %v985_v3  ;;  %1009 = vmatprep.subr.bf16.mxu1 (!%p142_p9), %v993_v24  ;;  %v1001_v30 = vpack.c.bf16 (!%p142_p9), %v535_v29, %v534_v28  ;;  %v1005_v33 = vpack.c.bf16 (!%p142_p9), %v537_v32, %v536_v31  ;;  %s1154_s26 = smov (!%p142_p9), [#allocation2]  }
  0x12   : > { %990 = vmatprep.subr.bf16.mxu0 (!%p142_p9), %v989_v5  ;;  %1013 = vmatpush3.bf16.msra.mxu1 (!%p142_p9), %v993_v24  ;;  %s1094_s27 = sshll.u32 (!%p142_p9), %s1154_s26, 4  ;;  %s1095_s27 = int_to_ptr.vmem [resolvable:$false] %s1094_s27 }
  0x13   : > { %1010 = vmatprep.subr.bf16.mxu1 (!%p142_p9), %v997_v27  ;;  %s1096_s28 = scalar_lea.vmem (!%p142_p9), %s1095_s27, 4096 }
  0x15   : > { %s1504_s30 = smov (!%p166_p10, %s829_s30), 31  ;;  %992 = vmatpush3.bf16.msra.mxu0 %v989_v5 }
  0x16   : > { %s830_s6 = sshll.u32 %s1504_s30, 3  ;;  %994 = vmatprep.subr.bf16.mxu0 %v993_v24  ;;  %1014 = vmatpush3.bf16.msra.mxu1 %v997_v27 }
  0x17   : > { %s1241_s9 = scalar_lea.vmem %s1493_s0, %s830_s6  ;;  %1011 = vmatprep.subr.bf16.mxu1 %v1001_v30 }
  0x18   : > { %v172_v6 = vld [vmem:[%s1241_s9] sm:$0xff]  ;;  %v173_v7 = vld [vmem:[%s1241_s9 + $0x8] sm:$0xff]  ;;  %v174_v8 = vld [vmem:[%s1241_s9 + $0x10] sm:$0xff] }
  0x19   : > { %921 = vmatprep.mubr.msk.f32.mxu0 %vm192_vm0, %v172_v6  ;;  %v175_v9 = vld [vmem:[%s1241_s9 + $0x18] sm:$0xff]  ;;  %v176_v10 = vld [vmem:[%s1241_s9 + $0x20] sm:$0xff]  ;;  %v177_v11 = vld [vmem:[%s1241_s9 + $0x28] sm:$0xff] }
  0x1a   : > { %922 = vmatmul.mubr.msk.f32.vlgmr.msra.gmra.mrb[0].mxu0 %vm192_vm0, %v173_v7  ;;  %v178_v12 = vld [vmem:[%s1241_s9 + $0x30] sm:$0xff]  ;;  %v179_v13 = vld [vmem:[%s1241_s9 + $0x38] sm:$0xff]  ;;  %v180_v14 = vld [vmem:[%s1241_s9 + $0x40] sm:$0xff]  ;;  %1015 = vmatpush3.bf16.msra.mxu1 %v1001_v30 }
  0x1b   : > { %924 = vmatprep.mubr.msk.f32.mxu0 %vm192_vm0, %v174_v8  ;;  %v181_v15 = vld [vmem:[%s1241_s9 + $0x48] sm:$0xff]  ;;  %v182_v16 = vld [vmem:[%s1241_s9 + $0x50] sm:$0xff]  ;;  %v183_v17 = vld [vmem:[%s1241_s9 + $0x58] sm:$0xff]  ;;  %996 = vmatpush3.bf16.msra.mxu0 %v993_v24 }
  0x1c   : > { %v184_v18 = vld [vmem:[%s1241_s9 + $0x60] sm:$0xff]  ;;  %v185_v19 = vld [vmem:[%s1241_s9 + $0x68] sm:$0xff]  ;;  %v186_v20 = vld [vmem:[%s1241_s9 + $0x70] sm:$0xff]  ;;  %998 = vmatprep.subr.bf16.mxu0 %v997_v27  ;;  %1012 = vmatprep.subr.bf16.mxu1 %v1005_v33 }
  0x1d   : > { %v187_v21 = vld [vmem:[%s1241_s9 + $0x78] sm:$0xff]  ;;  %s828_s9 = sshll.u32 %s162_s8, 7 }
  0x1e   : > { %925 = vmatmul.mubr.msk.f32.gmra.mrb[2].mxu0 %vm192_vm0, %v175_v9  ;;  %1016 = vmatpush3.bf16.msra.mxu1 %v1005_v33  ;;  %s1423_s10 = scalar_lea.vmem [#allocation2], %s828_s9 }
  0x1f   : > { %927 = vmatprep.mubr.msk.f32.mxu0 %vm192_vm0, %v176_v10  ;;  %1000 = vmatpush3.bf16.msra.mxu0 %v997_v27  ;;  %s762_s17 = sshll.u32 %s1423_s10, 4  ;;  %s1446_s17 = int_to_ptr.vmem [resolvable:$true] %s762_s17 }
  0x20   : > { %1002 = vmatprep.subr.bf16.mxu0 %v1001_v30  ;;  %s1090_s25 = scalar_lea.vmem %s1446_s17, 2048  ;;  %p1097_p0 = scmp.lt.s32.totalorder %s1446_s17, %s1095_s27 }
  0x21   : > { %p1091_p11 = scmp.ne.s32.totalorder %s1446_s17, %s1090_s25  ;;  %p1098_p1 = scmp.lt.s32.totalorder %s1096_s28, %s1090_s25 }
  0x22   : > { %928 = vmatmul.mubr.msk.f32.gmra.mrb[4].mxu0 %vm192_vm0, %v177_v11 }
  0x23   : > { %930 = vmatprep.mubr.msk.f32.mxu0 %vm192_vm0, %v178_v12  ;;  %1004 = vmatpush3.bf16.msra.mxu0 %v1001_v30  ;;  %p1092_p12 = pnand %p1091_p11, %p1215_p5  ;;  %p1099_p2 = por %p1098_p1, %p1097_p0 }
  0x24   : > { %1006 = vmatprep.subr.bf16.mxu0 %v1005_v33 }
  0x25   : > { %p1093_p13 = pneg %p1092_p12 }
  0x26   : > { %931 = vmatmul.mubr.msk.f32.gmra.mrb[6].mxu0 %vm192_vm0, %v179_v13 }
  0x27   : > { %933 = vmatprep.mubr.msk.f32.mxu0 %vm192_vm0, %v180_v14  ;;  %1008 = vmatpush3.bf16.msra.mxu0 %v1005_v33  ;;  %p1100_p3 = pnand %p1099_p2, %p1093_p13 }
  0x2a   : > { %934 = vmatmul.mubr.msk.f32.gmra.mrb[8].mxu0 %vm192_vm0, %v181_v15 }
  0x2b   : > { %936 = vmatprep.mubr.msk.f32.mxu0 %vm192_vm0, %v182_v16 }
  0x2e   : > { %937 = vmatmul.mubr.msk.f32.gmra.mrb[10].mxu0 %vm192_vm0, %v183_v17 }
  0x2f   : > { %939 = vmatprep.mubr.msk.f32.mxu0 %vm192_vm0, %v184_v18 }
  0x32   : > { %940 = vmatmul.mubr.msk.f32.gmra.mrb[12].mxu0 %vm192_vm0, %v185_v19 }
  0x33   : > { %942 = vmatprep.mubr.msk.f32.mxu0 %vm192_vm0, %v186_v20 }
  0x36   : > { %943 = vmatmul.mubr.msk.f32.gmra.mrb[14].mxu0 %vm192_vm0, %v187_v21 }
  0xed   : > { %v923_v34 = vpop.f32.mrb[0].mxu0 }
  0xee   : > { %v403_v35 = vmul.f32 0.044715, %v923_v34  ;;  %v1299_v36 = vpop.f32.mrb[1].mxu0  ;;  %v387_v24 = vmul.f32 0.5, %v923_v34 }
  0xef   : > { %v402_v37 = vmul.f32 0.044715, %v1299_v36  ;;  %v386_v31 = vmul.f32 0.5, %v1299_v36 }
  0xf0   : > { %v419_v38 = vmul.f32 %v923_v34, %v403_v35 }
  0xf1   : > { %v418_v39 = vmul.f32 %v402_v37, %v1299_v36  ;;  %v1303_v40 = vpop.f32.mrb[2].mxu0 }
  0xf2   : > { %v435_v41 = vmul.f32 %v923_v34, %v419_v38  ;;  %v405_v42 = vmul.f32 0.044715, %v1303_v40  ;;  %v1306_v43 = vpop.f32.mrb[3].mxu0  ;;  %v389_v38 = vmul.f32 0.5, %v1303_v40 }
  0xf3   : > { %v434_v44 = vmul.f32 %v418_v39, %v1299_v36  ;;  %v404_v45 = vmul.f32 0.044715, %v1306_v43 }
  0xf4   : > { %v451_v46 = vadd.f32 %v923_v34, %v435_v41  ;;  %v421_v47 = vmul.f32 %v1303_v40, %v405_v42 }
  0xf5   : > { %v450_v48 = vadd.f32 %v434_v44, %v1299_v36  ;;  %v420_v49 = vmul.f32 %v404_v45, %v1306_v43  ;;  %v1313_v50 = vpop.f32.mrb[4].mxu0 }
  0xf6   : > { %v467_v51 = vmul.f32 0.7978846, %v451_v46  ;;  %v437_v52 = vmul.f32 %v1303_v40, %v421_v47  ;;  %v407_v53 = vmul.f32 0.044715, %v1313_v50  ;;  %v1317_v54 = vpop.f32.mrb[5].mxu0 }
  0xf7   : > { %v466_v55 = vmul.f32 0.7978846, %v450_v48  ;;  %v436_v56 = vmul.f32 %v420_v49, %v1306_v43  ;;  %v406_v57 = vmul.f32 0.044715, %v1317_v54  ;;  %v388_v48 = vmul.f32 0.5, %v1306_v43 }
  0xf8   : > { %1058 = vtanh.f32 %v467_v51  ;;  %v453_v58 = vadd.f32 %v1303_v40, %v437_v52  ;;  %v423_v59 = vmul.f32 %v1313_v50, %v407_v53 }
  0xf9   : > { %1060 = vtanh.f32 %v466_v55  ;;  %v422_v60 = vmul.f32 %v406_v57, %v1317_v54  ;;  %v1324_v61 = vpop.f32.mrb[6].mxu0  ;;  %v452_v62 = vadd.f32 %v436_v56, %v1306_v43 }
  0xfa   : > { %v469_v63 = vmul.f32 0.7978846, %v453_v58  ;;  %v439_v0 = vmul.f32 %v1313_v50, %v423_v59  ;;  %v409_v1 = vmul.f32 0.044715, %v1324_v61  ;;  %v1329_v2 = vpop.f32.mrb[7].mxu0 }
  0xfb   : > { %v438_v3 = vmul.f32 %v422_v60, %v1317_v54  ;;  %v408_v4 = vmul.f32 0.044715, %v1329_v2  ;;  %v468_v5 = vmul.f32 0.7978846, %v452_v62 }
  0xfc   : > { %1062 = vtanh.f32 %v469_v63  ;;  %v455_v6 = vadd.f32 %v1313_v50, %v439_v0  ;;  %v425_v7 = vmul.f32 %v1324_v61, %v409_v1  ;;  %v391_v63 = vmul.f32 0.5, %v1313_v50 }
  0xfd   : > { %v454_v8 = vadd.f32 %v438_v3, %v1317_v54  ;;  %v424_v9 = vmul.f32 %v408_v4, %v1329_v2  ;;  %v1337_v10 = vpop.f32.mrb[8].mxu0  ;;  %1064 = vtanh.f32 %v468_v5 }
  0xfe   : > { %v471_v11 = vmul.f32 0.7978846, %v455_v6  ;;  %v441_v12 = vmul.f32 %v1324_v61, %v425_v7  ;;  %v411_v13 = vmul.f32 0.044715, %v1337_v10  ;;  %v1341_v14 = vpop.f32.mrb[9].mxu0  ;;  %v390_v6 = vmul.f32 0.5, %v1317_v54 }
  0xff   : > { %v470_v15 = vmul.f32 0.7978846, %v454_v8  ;;  %v440_v16 = vmul.f32 %v424_v9, %v1329_v2  ;;  %v410_v17 = vmul.f32 0.044715, %v1341_v14 }
 0x100   : > { %1066 = vtanh.f32 %v471_v11  ;;  %v457_v18 = vadd.f32 %v1324_v61, %v441_v12  ;;  %v427_v19 = vmul.f32 %v1337_v10, %v411_v13 }
 0x101   : > { %1068 = vtanh.f32 %v470_v15  ;;  %v456_v20 = vadd.f32 %v440_v16, %v1329_v2  ;;  %v426_v21 = vmul.f32 %v410_v17, %v1341_v14  ;;  %v1349_v22 = vpop.f32.mrb[10].mxu0 }
 0x102   : > { %v1059_v23 = vpop.eup %1058  ;;  %v473_v25 = vmul.f32 0.7978846, %v457_v18  ;;  %v443_v26 = vmul.f32 %v1337_v10, %v427_v19  ;;  %v413_v27 = vmul.f32 0.044715, %v1349_v22  ;;  %v1353_v28 = vpop.f32.mrb[11].mxu0 }
 0x103   : > { %v1061_v29 = vpop.eup %1060  ;;  %v499_v30 = vadd.f32 1.0, %v1059_v23  ;;  %v472_v32 = vmul.f32 0.7978846, %v456_v20  ;;  %v442_v33 = vmul.f32 %v426_v21, %v1341_v14  ;;  %v412_v34 = vmul.f32 0.044715, %v1353_v28 }
 0x104   : > { %1070 = vtanh.f32 %v473_v25  ;;  %v459_v35 = vadd.f32 %v1337_v10, %v443_v26  ;;  %v429_v37 = vmul.f32 %v1349_v22, %v413_v27  ;;  %v498_v42 = vadd.f32 1.0, %v1061_v29 }
 0x105   : > { %1072 = vtanh.f32 %v472_v32  ;;  %v458_v39 = vadd.f32 %v442_v33, %v1341_v14  ;;  %v1362_v41 = vpop.f32.mrb[12].mxu0  ;;  %v428_v46 = vmul.f32 %v412_v34, %v1353_v28  ;;  %v515_v51 = vmul.f32 %v499_v30, %v387_v24 }
 0x106   : > { %v1063_v44 = vpop.eup %1062  ;;  %v475_v36 = vmul.f32 0.7978846, %v459_v35  ;;  %v445_v45 = vmul.f32 %v1349_v22, %v429_v37  ;;  %v1366_v47 = vpop.f32.mrb[13].mxu0  ;;  %v415_v40 = vmul.f32 0.044715, %v1362_v41  ;;  %v514_v53 = vmul.f32 %v498_v42, %v386_v31 }
 0x107   : > { %v1065_v49 = vpop.eup %1064  ;;  %v474_v52 = vmul.f32 0.7978846, %v458_v39  ;;  %v444_v56 = vmul.f32 %v428_v46, %v1353_v28  ;;  %v414_v57 = vmul.f32 0.044715, %v1366_v47  ;;  %v501_v60 = vadd.f32 1.0, %v1063_v44 }
 0x108   : > { %1074 = vtanh.f32 %v475_v36  ;;  %v461_v55 = vadd.f32 %v1349_v22, %v445_v45  ;;  %v431_v58 = vmul.f32 %v1362_v41, %v415_v40  ;;  %961 = vmatprep.mubr.msk.f32.mxu0 %vm538_vm1, %v514_v53  ;;  %v500_v43 = vadd.f32 1.0, %v1065_v49 }
 0x109   : > { %1076 = vtanh.f32 %v474_v52  ;;  %v1375_v59 = vpop.f32.mrb[14].mxu0  ;;  %v460_v1 = vadd.f32 %v444_v56, %v1353_v28  ;;  %v430_v3 = vmul.f32 %v414_v57, %v1366_v47  ;;  %962 = vmatmul.mubr.msk.f32.vlgmr.msra.gmra.mrb[16].mxu0 %vm538_vm1, %v515_v51  ;;  %v517_v17 = vmul.f32 %v501_v60, %v389_v38 }
 0x10a   : > { %v1067_v62 = vpop.eup %1066  ;;  %v477_v0 = vmul.f32 0.7978846, %v461_v55  ;;  %v1381_v4 = vpop.f32.mrb[15].mxu0  ;;  %v447_v7 = vmul.f32 %v1362_v41, %v431_v58  ;;  %v417_v8 = vmul.f32 0.044715, %v1375_v59  ;;  %v516_v12 = vmul.f32 %v500_v43, %v388_v48 }
 0x10b   : > { %v1069_v5 = vpop.eup %1068  ;;  %v416_v9 = vmul.f32 0.044715, %v1381_v4  ;;  %v476_v50 = vmul.f32 0.7978846, %v460_v1  ;;  %v446_v11 = vmul.f32 %v430_v3, %v1366_v47  ;;  %v503_v20 = vadd.f32 1.0, %v1067_v62 }
 0x10c   : > { %1078 = vtanh.f32 %v477_v0  ;;  %v463_v13 = vadd.f32 %v1362_v41, %v447_v7  ;;  %v433_v15 = vmul.f32 %v1375_v59, %v417_v8  ;;  %964 = vmatprep.mubr.msk.f32.mxu1 %vm538_vm1, %v516_v12  ;;  %v502_v19 = vadd.f32 1.0, %v1069_v5 }
 0x10d   : > { %v432_v16 = vmul.f32 %v416_v9, %v1381_v4  ;;  %1080 = vtanh.f32 %v476_v50  ;;  %v462_v54 = vadd.f32 %v446_v11, %v1366_v47  ;;  %v392_v23 = vmul.f32 0.5, %v1329_v2  ;;  %965 = vmatmul.mubr.msk.f32.vlgmr.msra.gmra.mrb[0].mxu1 %vm538_vm1, %v517_v17 }
 0x10e   : > { %v1071_v18 = vpop.eup %1070  ;;  %v479_v24 = vmul.f32 0.7978846, %v463_v13  ;;  %v449_v25 = vmul.f32 %v1375_v59, %v433_v15  ;;  %v518_v29 = vmul.f32 %v502_v19, %v390_v6  ;;  %v519_v35 = vmul.f32 %v503_v20, %v391_v63 }
 0x10f   : > { %v1073_v21 = vpop.eup %1072  ;;  %v448_v26 = vmul.f32 %v432_v16, %v1381_v4  ;;  %v478_v27 = vmul.f32 0.7978846, %v462_v54  ;;  %v505_v31 = vadd.f32 1.0, %v1071_v18  ;;  %v393_v38 = vmul.f32 0.5, %v1324_v61 }
 0x110   : > { %v504_v30 = vadd.f32 1.0, %v1073_v21  ;;  %1082 = vtanh.f32 %v479_v24  ;;  %v465_v32 = vadd.f32 %v1375_v59, %v449_v25  ;;  %967 = vmatprep.mubr.msk.f32.mxu1 %vm538_vm1, %v518_v29  ;;  %v394_v44 = vmul.f32 0.5, %v1341_v14 }
 0x111   : > { %v464_v33 = vadd.f32 %v448_v26, %v1381_v4  ;;  %1084 = vtanh.f32 %v478_v27  ;;  %968 = vmatmul.mubr.msk.f32.gmra.mrb[2].mxu1 %vm538_vm1, %v519_v35  ;;  %v521_v45 = vmul.f32 %v505_v31, %v393_v38  ;;  %v395_v51 = vmul.f32 0.5, %v1337_v10 }
 0x112   : > { %v1075_v37 = vpop.eup %1074  ;;  %v520_v2 = vmul.f32 %v504_v30, %v392_v23  ;;  %v481_v39 = vmul.f32 0.7978846, %v465_v32  ;;  %v396_v52 = vmul.f32 0.5, %v1353_v28  ;;  %v397_v56 = vmul.f32 0.5, %v1349_v22 }
 0x113   : > { %v1077_v34 = vpop.eup %1076  ;;  %v480_v42 = vmul.f32 0.7978846, %v464_v33  ;;  %v507_v46 = vadd.f32 1.0, %v1075_v37  ;;  %v398_v43 = vmul.f32 0.5, %v1366_v47  ;;  %v399_v28 = vmul.f32 0.5, %v1362_v41 }
 0x114   : > { %970 = vmatprep.mubr.msk.f32.mxu1 %vm538_vm1, %v520_v2  ;;  %v506_v36 = vadd.f32 1.0, %v1077_v34  ;;  %1086 = vtanh.f32 %v481_v39  ;;  %v400_v1 = vmul.f32 0.5, %v1381_v4  ;;  %v401_v6 = vmul.f32 0.5, %v1375_v59 }
 0x115   : > { %1088 = vtanh.f32 %v480_v42  ;;  %971 = vmatmul.mubr.msk.f32.gmra.mrb[4].mxu1 %vm538_vm1, %v521_v45  ;;  %v523_v40 = vmul.f32 %v507_v46, %v395_v51 }
 0x116   : > { %v1079_v48 = vpop.eup %1078  ;;  %v522_v49 = vmul.f32 %v506_v36, %v394_v44 }
 0x117   : > { %v1081_v61 = vpop.eup %1080  ;;  %v509_v53 = vadd.f32 1.0, %v1079_v48 }
 0x118   : > { %973 = vmatprep.mubr.msk.f32.mxu1 %vm538_vm1, %v522_v49  ;;  %v508_v14 = vadd.f32 1.0, %v1081_v61 }
 0x119   : > { %974 = vmatmul.mubr.msk.f32.gmra.mrb[6].mxu1 %vm538_vm1, %v523_v40  ;;  %v525_v10 = vmul.f32 %v509_v53, %v397_v56 }
 0x11a   : > { %v1083_v55 = vpop.eup %1082  ;;  %v524_v57 = vmul.f32 %v508_v14, %v396_v52 }
 0x11b   : > { %v1085_v58 = vpop.eup %1084  ;;  %v511_v62 = vadd.f32 1.0, %v1083_v55 }
 0x11c   : > { %976 = vmatprep.mubr.msk.f32.mxu1 %vm538_vm1, %v524_v57  ;;  %v510_v60 = vadd.f32 1.0, %v1085_v58 }
 0x11d   : > { %977 = vmatmul.mubr.msk.f32.gmra.mrb[8].mxu1 %vm538_vm1, %v525_v10  ;;  %v527_v3 = vmul.f32 %v511_v62, %v399_v28 }
 0x11e   : > { %v1087_v63 = vpop.eup %1086  ;;  %v526_v0 = vmul.f32 %v510_v60, %v398_v43 }
 0x11f   : > { %v1089_v22 = vpop.eup %1088  ;;  %v513_v5 = vadd.f32 1.0, %v1087_v63 }
 0x120   : > { %979 = vmatprep.mubr.msk.f32.mxu1 %vm538_vm1, %v526_v0  ;;  %v512_v47 = vadd.f32 1.0, %v1089_v22 }
 0x121   : > { %980 = vmatmul.mubr.msk.f32.gmra.mrb[10].mxu1 %vm538_vm1, %v527_v3  ;;  %v529_v41 = vmul.f32 %v513_v5, %v401_v6 }
 0x122   : > { %v528_v7 = vmul.f32 %v512_v47, %v400_v1 }
 0x124   : > { %982 = vmatprep.mubr.msk.f32.mxu1 %vm538_vm1, %v528_v7 }
 0x125   : > { %983 = vmatmul.mubr.msk.f32.gmra.mrb[12].mxu1 %vm538_vm1, %v529_v41 }
 0x1dc   : > { %v963_v8 = vpop.f32.mrb[16].mxu0 }
 0x1dd   : > { %733 = vst [vmem:[%s1423_s10 + $0x8] sm:$0xff] %v963_v8  ;;  %v653_v59 = vpop.f32.mrb[17].mxu0 }
 0x1de   : > { %732 = vst [vmem:[%s1423_s10] sm:$0xff] %v653_v59 }
 0x1e0   : > { %v966_v4 = vpop.f32.mrb[0].mxu1 }
 0x1e1   : > { %735 = vst [vmem:[%s1423_s10 + $0x18] sm:$0xff] %v966_v4  ;;  %v663_v9 = vpop.f32.mrb[1].mxu1 }
 0x1e2   : > { %734 = vst [vmem:[%s1423_s10 + $0x10] sm:$0xff] %v663_v9 }
 0x1e4   : > { %v969_v50 = vpop.f32.mrb[2].mxu1 }
 0x1e5   : > { %737 = vst [vmem:[%s1423_s10 + $0x28] sm:$0xff] %v969_v50  ;;  %v673_v11 = vpop.f32.mrb[3].mxu1 }
 0x1e6   : > { %736 = vst [vmem:[%s1423_s10 + $0x20] sm:$0xff] %v673_v11 }
 0x1e8   : > { %v972_v12 = vpop.f32.mrb[4].mxu1 }
 0x1e9   : > { %739 = vst [vmem:[%s1423_s10 + $0x38] sm:$0xff] %v972_v12  ;;  %v683_v13 = vpop.f32.mrb[5].mxu1 }
 0x1ea   : > { %738 = vst [vmem:[%s1423_s10 + $0x30] sm:$0xff] %v683_v13 }
 0x1ec   : > { %v975_v15 = vpop.f32.mrb[6].mxu1 }
 0x1ed   : > { %741 = vst [vmem:[%s1423_s10 + $0x48] sm:$0xff] %v975_v15  ;;  %v693_v16 = vpop.f32.mrb[7].mxu1 }
 0x1ee   : > { %740 = vst [vmem:[%s1423_s10 + $0x40] sm:$0xff] %v693_v16 }
 0x1f0   : > { %v978_v17 = vpop.f32.mrb[8].mxu1 }
 0x1f1   : > { %743 = vst [vmem:[%s1423_s10 + $0x58] sm:$0xff] %v978_v17  ;;  %v703_v18 = vpop.f32.mrb[9].mxu1 }
 0x1f2   : > { %742 = vst [vmem:[%s1423_s10 + $0x50] sm:$0xff] %v703_v18 }
 0x1f4   : > { %v981_v54 = vpop.f32.mrb[10].mxu1 }
 0x1f5   : > { %745 = vst [vmem:[%s1423_s10 + $0x68] sm:$0xff] %v981_v54  ;;  %v713_v19 = vpop.f32.mrb[11].mxu1 }
 0x1f6   : > { %744 = vst [vmem:[%s1423_s10 + $0x60] sm:$0xff] %v713_v19 }
 0x1f8   : > { %v984_v20 = vpop.f32.mrb[12].mxu1 }
 0x1f9   : > { %747 = vst [vmem:[%s1423_s10 + $0x78] sm:$0xff] %v984_v20  ;;  %v723_v21 = vpop.f32.mrb[13].mxu1 }
 0x1fa   : > { %746 = vst [vmem:[%s1423_s10 + $0x70] sm:$0xff] %v723_v21 }
 0x1fb   : > { %1103 = shalt.err (!%p1100_p3)
}
 0x1fc   : > { %s1104_s29 = scalar_lea.hbm %s1444_s24, 2048  ;;  %s1108_s5 = scalar_lea.hbm %s1496_s3, 4096 }
 0x1fd   : > { %p1105_p4 = scmp.ne.s32.totalorder %s1444_s24, %s1104_s29  ;;  %p1109_p9 = scmp.lt.u32.totalorder %s1444_s24, %s1496_s3 }
 0x1fe   : > { %p1110_p10 = scmp.lt.u32.totalorder %s1108_s5, %s1104_s29  ;;  %p1112_p12 = scmp.lt.u32.totalorder %s1104_s29, %s1444_s24 }
 0x1ff   : > { %p1106_p7 = pnand %p1105_p4, %p1215_p5 }
 0x200   : > { %p1111_p11 = por %p1110_p10, %p1109_p9 }
 0x201   : > { %p1107_p8 = pneg %p1106_p7 }
 0x202   : > { %p1113_p13 = por %p1112_p12, %p1111_p11 }
 0x204   : > { %p1114_p0 = pnand %p1113_p13, %p1107_p8 }
 0x206   : > { %1117 = shalt.err (!%p1114_p0)
}
 0x207   : > { %s1155_s8 = smov 128   ;;  %s1156_s9 = smov 8  }
 0x208   : > { %1017 = dma.vmem_to_hbm [thread:$0]  (%p1215_p5), %s1446_s17, 2048, %s1444_s24, %s1452_s16, %s1155_s8, %s1155_s8, %s1156_s9  }
 0x209 PF: > { %p1023_p1 = scmp.ge.s32.totalorder %s1152_s15, 2  ;;  %s777_s10 = sand.u32 1, %s1140_s12  }
 0x20a   : > { %s778_s11 = scalar_lea.sflag [#allocation3], %s777_s10 }
 0x20b   : > { %p1020_p2 = pnand %p1023_p1, %p1219_p6 }
 0x20d   : > { %1135 = dma.done.wait (!%p1020_p2), %s778_s11, 2048  }
 0x20e   : > { %1137 = vsyncadd (!%p1020_p2), %s778_s11, 4294965248  ;;  %p13_p3 = scmp.ge.s32.totalorder %s1202_s18, 4   ;;  %s1499_s12 = smov %s1144_s13 }
 0x20f   : > { %s1500_s13 = smov %s1148_s14  ;;  %s1501_s14 = smov %s1213_s21 }
 0x210   : > { %s1502_s15 = smov %s1202_s18  ;;  %15 = sbr.rel (!%p13_p3) target bundleno = 3 (0x3), region = 67 }
 0x217   :  { %783 = vsyncpa [#allocation3], 1 }
 0x218   :  { %785 = vsyncpa [#allocation3 + $0x1], 1 }

</bundles_post_ra>
